<compile_context>
chip_gen: v5e
topology: v5e:2x2
jax: 0.10.0
libtpu: 0.0.40
codegen_flags: <defaults>
</compile_context>

<pallas_src>
import jax
import jax.numpy as jnp
from jax import lax
from jax.experimental import pallas as pl
from jax.experimental.pallas import tpu as pltpu

LANES = 128
# (lane offset, size, activation) for match_result, double_chance, goals, over_under
OUT_SLOTS = ((0, 3, "softmax"), (3, 3, "sigmoid"), (6, 2, "softmax"), (8, 2, "softmax"))
N_OUT_TOTAL = 10
SIGMOID_LO, SIGMOID_HI = 3, 6  # lanes of the sigmoid (double_chance) head
TB_MAX = 1024                  # safe on v5e/v6e/v7x; v6e could go 2048


def serie_a_kernel(x_ref, w1_ref, w2_ref, wh_ref, wo_ref, s_ref, aff_ref, out_ref):
    # aff rows: 0=t1, 1=t2, 2=th, 3=bo, 4=c (denominator constant), 5..7 unused
    t1 = aff_ref[0:1, :]
    t2 = aff_ref[1:2, :]
    th = aff_ref[2:3, :]
    bo = aff_ref[3:4, :]
    c = aff_ref[4:5, :]

    wdt = w1_ref.dtype  # bf16 (matmul operands only; all elementwise work in f32)

    # ---- feature extractor: Linear(+folded BN scale) -> +shift -> ReLU ----
    h1 = jnp.dot(x_ref[...], w1_ref[...], preferred_element_type=jnp.float32)
    h1 = jnp.maximum(h1 + t1, 0.0)

    h2 = jnp.dot(h1.astype(wdt), w2_ref[...], preferred_element_type=jnp.float32)
    feat = jnp.maximum(h2 + t2, 0.0)

    # ---- fused head hidden layer (4 heads in one matmul) ----
    hh = jnp.dot(feat.astype(wdt), wh_ref[...], preferred_element_type=jnp.float32)
    hh = jnp.maximum(hh + th, 0.0)

    # ---- fused block-diagonal output layer -> logits [TB, 128] (lanes 0..9 real) ----
    logits = jnp.dot(hh.astype(wdt), wo_ref[...], preferred_element_type=jnp.float32) + bo

    # ---- single-pass segmented softmax/sigmoid epilogue ----
    lane = lax.broadcasted_iota(jnp.int32, logits.shape, 1)
    sigmoid_mask = (lane >= SIGMOID_LO) & (lane < SIGMOID_HI)
    softmax_mask = (lane < N_OUT_TOTAL) & jnp.logical_not(sigmoid_mask)

    neg_big = jnp.float32(-1e30)
    # One global max over all softmax lanes: exact per-segment softmax as long as
    # head logits stay within ~80 of each other (true for this small net).
    m = jnp.max(jnp.where(softmax_mask, logits, neg_big), axis=-1, keepdims=True)
    arg = jnp.where(softmax_mask, logits - m,
                    jnp.where(sigmoid_mask, -logits, neg_big))
    e = jnp.exp(arg)  # ONE EUP pass for the whole block

    # Denominator per lane via MXU: softmax lanes -> segment sum of e,
    # sigmoid lanes -> e + 1, padding lanes -> 1 (numerator there is 0).
    denom = jnp.dot(e, s_ref[...], preferred_element_type=jnp.float32) + c
    num = jnp.where(sigmoid_mask, 1.0, e)  # sigmoid(x) = 1 / (1 + exp(-x))

    out_ref[...] = (num / denom).astype(out_ref.dtype)  # single lane-dense store


# ----------------------------- parameter handling -----------------------------

def _fold_bn(lin_bias, gamma, beta, running_mean, running_var, eps=1e-5):
    """Fold Linear bias + BatchNorm1d(eval) into per-feature (scale, shift)."""
    scale = gamma / jnp.sqrt(running_var + eps)
    shift = (lin_bias - running_mean) * scale + beta
    return scale, shift


def make_raw_params(input_size, hidden_size, key):
    """Deterministic synthetic parameters with the PyTorch module's shapes."""
    ks = iter(jax.random.split(key, 64))

    def lin(n_in, n_out):
        w = jax.random.normal(next(ks), (n_in, n_out), jnp.float32) * 0.1
        b = jax.random.normal(next(ks), (n_out,), jnp.float32) * 0.05
        return w, b

    def bn(n):
        gamma = 1.0 + 0.1 * jax.random.normal(next(ks), (n,), jnp.float32)
        beta = 0.1 * jax.random.normal(next(ks), (n,), jnp.float32)
        mean = 0.1 * jax.random.normal(next(ks), (n,), jnp.float32)
        var = 1.0 + 0.1 * jax.random.uniform(next(ks), (n,), jnp.float32)
        return gamma, beta, mean, var

    h, h2, h4 = hidden_size, hidden_size // 2, hidden_size // 4
    p = {"lin1": lin(input_size, h), "bn1": bn(h),
         "lin2": lin(h, h2), "bn2": bn(h2)}
    for name, n_out in (("mr", 3), ("dc", 3), ("g", 2), ("ou", 2)):
        p[f"{name}_hid"] = lin(h2, h4)
        p[f"{name}_bn"] = bn(h4)
        p[f"{name}_out"] = lin(h4, n_out)
    return p


def pack_params(p, hidden_size, weight_dtype=jnp.bfloat16):
    """Pack all params into 4 padded scale-folded weights + indicator S + affine slab."""
    h, h2, h4 = hidden_size, hidden_size // 2, hidden_size // 4
    assert h <= LANES and h2 <= LANES and 4 * h4 <= LANES

    def pad2(w):
        return jnp.pad(w, ((0, 0), (0, LANES - w.shape[1])))

    def padrows(w):
        return jnp.pad(w, ((0, LANES - w.shape[0]), (0, 0)))

    def padvec(v):
        return jnp.pad(v, (0, LANES - v.shape[0]))

    # feature extractor (BN scale folded into weight columns, shift kept separate)
    w1, b1 = p["lin1"]
    s1, t1 = _fold_bn(b1, *p["bn1"])
    w2, b2 = p["lin2"]
    s2, t2 = _fold_bn(b2, *p["bn2"])
    W1 = pad2(w1 * s1[None, :])            # [F, 128]
    W2 = pad2(padrows(w2 * s2[None, :]))   # [128, 128]

    # fused head hidden layer: per-head scale fold, then concat -> [h2, 4*h4]
    heads = ("mr", "dc", "g", "ou")
    folded = [_fold_bn(p[f"{n}_hid"][1], *p[f"{n}_bn"]) for n in heads]
    wh = jnp.concatenate(
        [p[f"{n}_hid"][0] * f[0][None, :] for n, f in zip(heads, folded)], axis=1)
    th = jnp.concatenate([f[1] for f in folded])
    WH = pad2(padrows(wh))                 # [128, 128]

    # fused block-diagonal output layer: [4*h4, 10] embedded in [128, 128]
    WO = jnp.zeros((LANES, LANES), jnp.float32)
    bo = jnp.zeros((LANES,), jnp.float32)
    for i, (n, (off, size, _)) in enumerate(zip(heads, OUT_SLOTS)):
        w, b = p[f"{n}_out"]
        WO = WO.at[i * h4:(i + 1) * h4, off:off + size].set(w)
        bo = bo.at[off:off + size].set(b)

    # segment-indicator matrix S and denominator constant c:
    #   softmax segment: S[i, j] = 1 for i, j in same segment
    #   sigmoid lanes:   S[i, i] = 1 and c[i] = 1  (denom = 1 + exp(-x))
    #   padding lanes:   c[i] = 1                  (denom = 1, numerator = 0)
    S = jnp.zeros((LANES, LANES), jnp.float32)
    c = jnp.zeros((LANES,), jnp.float32)
    for off, size, kind in OUT_SLOTS:
        if kind == "softmax":
            S = S.at[off:off + size, off:off + size].set(1.0)
        else:
            for j in range(off, off + size):
                S = S.at[j, j].set(1.0)
            c = c.at[off:off + size].set(1.0)
    c = c.at[N_OUT_TOTAL:].set(1.0)

    aff = jnp.stack([padvec(t1), padvec(t2), padvec(th), bo, c,
                     jnp.zeros((LANES,), jnp.float32),
                     jnp.zeros((LANES,), jnp.float32),
                     jnp.zeros((LANES,), jnp.float32)])  # [8, 128], f32

    return (W1.astype(weight_dtype), W2.astype(weight_dtype),
            WH.astype(weight_dtype), WO.astype(weight_dtype),
            S.astype(jnp.float32), aff.astype(jnp.float32))


# --------------------------------- forward ------------------------------------

def _round_up(n, m):
    return -(-n // m) * m


def _pick_tb(B):
    """Batch tile: minimize padding, keep >=2 grid steps for v7x's 2 TCs."""
    b8 = _round_up(B, 8)
    if b8 <= 8:
        return 8
    n_steps = max(2, -(-b8 // TB_MAX))
    return min(TB_MAX, _round_up(-(-b8 // n_steps), 8))


def serie_a_forward(x, packed):
    B, F = x.shape
    W1, W2, WH, WO, S, aff = packed

    TB = _pick_tb(B)
    B_pad = _round_up(B, TB)

    x = x.astype(W1.dtype)  # bf16 matmul operand; halves input HBM traffic
    if B_pad != B:
        x = jnp.pad(x, ((0, B_pad - B), (0, 0)))

    const_spec = lambda shape: pl.BlockSpec(shape, lambda i: (0, 0))
    out_pad = pl.pallas_call(
        serie_a_kernel,
        out_shape=jax.ShapeDtypeStruct((B_pad, LANES), jnp.bfloat16),
        grid=(B_pad // TB,),
        in_specs=[
            pl.BlockSpec((TB, F), lambda i: (i, 0)),   # x blocked over batch
            const_spec(W1.shape), const_spec(W2.shape),
            const_spec(WH.shape), const_spec(WO.shape),
            const_spec(S.shape), const_spec(aff.shape),
        ],
        out_specs=pl.BlockSpec((TB, LANES), lambda i: (i, 0)),
        compiler_params=pltpu.CompilerParams(
            dimension_semantics=("parallel",),
            vmem_limit_bytes=32 * 1024 * 1024,
        ),
    )(x, W1, W2, WH, WO, S, aff)

    out = out_pad[:B].astype(jnp.float32)
    return {
        "match_result": out[:, 0:3],
        "double_chance": out[:, 3:6],
        "goals": out[:, 6:8],
        "over_under": out[:, 8:10],
    }


# ------------------------------ pure-JAX reference ----------------------------

def reference_forward(x, p):
    def bn_eval(z, gamma, beta, mean, var, eps=1e-5):
        return (z - mean) / jnp.sqrt(var + eps) * gamma + beta

    w1, b1 = p["lin1"]
    h = jnp.maximum(bn_eval(x @ w1 + b1, *p["bn1"]), 0.0)
    w2, b2 = p["lin2"]
    f = jnp.maximum(bn_eval(h @ w2 + b2, *p["bn2"]), 0.0)
    outs = {}
    for name, key, act in (("match_result", "mr", "softmax"),
                           ("double_chance", "dc", "sigmoid"),
                           ("goals", "g", "softmax"),
                           ("over_under", "ou", "softmax")):
        wh_, bh_ = p[f"{key}_hid"]
        hh = jnp.maximum(bn_eval(f @ wh_ + bh_, *p[f"{key}_bn"]), 0.0)
        wo_, bo_ = p[f"{key}_out"]
        logit = hh @ wo_ + bo_
        outs[name] = (jax.nn.softmax(logit, axis=-1) if act == "softmax"
                      else jax.nn.sigmoid(logit))
    return outs


if __name__ == "__main__":
    input_size = 32
    hidden_size = 32   # -> hidden//2 = 16, hidden//4 = 8
    batch = 8

    key = jax.random.PRNGKey(0)
    kx, kp = jax.random.split(key)
    x = jax.random.normal(kx, (batch, input_size), jnp.float32)

    raw = make_raw_params(input_size, hidden_size, kp)
    packed = pack_params(raw, hidden_size)

    fwd = jax.jit(lambda xx: serie_a_forward(xx, packed))
    out = fwd(x)
    jax.block_until_ready(out)

    # structural sanity checks
    assert out["match_result"].shape == (batch, 3)
    assert out["double_chance"].shape == (batch, 3)
    assert out["goals"].shape == (batch, 2)
    assert out["over_under"].shape == (batch, 2)
    assert bool(jnp.allclose(out["match_result"].sum(-1), 1.0, atol=2e-2))
    assert bool(jnp.allclose(out["goals"].sum(-1), 1.0, atol=2e-2))
    assert bool(jnp.allclose(out["over_under"].sum(-1), 1.0, atol=2e-2))
    assert bool(jnp.all((out["double_chance"] > -1e-6) & (out["double_chance"] < 1.0 + 1e-6)))
    assert bool(jnp.all(jnp.isfinite(out["match_result"])))

    # parity vs f32 pure-JAX eval-mode reference (bf16 weights/output tolerance)
    ref = reference_forward(x, raw)
    for k in ("match_result", "double_chance", "goals", "over_under"):
        assert bool(jnp.allclose(out[k], ref[k], atol=5e-2)), k

    print("KERNEL_OK")
</pallas_src>

<mosaic_0001>
module attributes {stable_mosaic.version = 11 : i64} {
  func.func @serie_a_kernel(%arg0: i32, %arg1: memref<8x32xbf16, #tpu.memory_space<vmem>>, %arg2: memref<32x128xbf16, #tpu.memory_space<vmem>>, %arg3: memref<128x128xbf16, #tpu.memory_space<vmem>>, %arg4: memref<128x128xbf16, #tpu.memory_space<vmem>>, %arg5: memref<128x128xbf16, #tpu.memory_space<vmem>>, %arg6: memref<128x128xf32, #tpu.memory_space<vmem>>, %arg7: memref<8x128xf32, #tpu.memory_space<vmem>>, %arg8: memref<8x128xbf16, #tpu.memory_space<vmem>>) attributes {dimension_semantics = [#tpu.dimension_semantics<parallel>], iteration_bounds = array<i64: 1>, scalar_prefetch = 0 : i64, scratch_operands = 0 : i64, tpu.core_type = #tpu.core_type<tc>, window_params = [{transform_indices = @transform_0, window_bounds = array<i64: 8, 32>}, {pipeline_mode = #tpu.pipeline_mode<synchronous>, transform_indices = @transform_1, window_bounds = array<i64: 32, 128>}, {pipeline_mode = #tpu.pipeline_mode<synchronous>, transform_indices = @transform_2, window_bounds = array<i64: 128, 128>}, {pipeline_mode = #tpu.pipeline_mode<synchronous>, transform_indices = @transform_3, window_bounds = array<i64: 128, 128>}, {pipeline_mode = #tpu.pipeline_mode<synchronous>, transform_indices = @transform_4, window_bounds = array<i64: 128, 128>}, {pipeline_mode = #tpu.pipeline_mode<synchronous>, transform_indices = @transform_5, window_bounds = array<i64: 128, 128>}, {pipeline_mode = #tpu.pipeline_mode<synchronous>, transform_indices = @transform_6, window_bounds = array<i64: 8, 128>}, {transform_indices = @transform_7, window_bounds = array<i64: 8, 128>}]} {
    %c0 = arith.constant 0 : index
    %c0_0 = arith.constant 0 : index
    %0 = vector.load %arg7[%c0, %c0_0] : memref<8x128xf32, #tpu.memory_space<vmem>>, vector<1x128xf32>
    %c1 = arith.constant 1 : index
    %c0_1 = arith.constant 0 : index
    %1 = vector.load %arg7[%c1, %c0_1] : memref<8x128xf32, #tpu.memory_space<vmem>>, vector<1x128xf32>
    %c2 = arith.constant 2 : index
    %c0_2 = arith.constant 0 : index
    %2 = vector.load %arg7[%c2, %c0_2] : memref<8x128xf32, #tpu.memory_space<vmem>>, vector<1x128xf32>
    %c3 = arith.constant 3 : index
    %c0_3 = arith.constant 0 : index
    %3 = vector.load %arg7[%c3, %c0_3] : memref<8x128xf32, #tpu.memory_space<vmem>>, vector<1x128xf32>
    %c4 = arith.constant 4 : index
    %c0_4 = arith.constant 0 : index
    %4 = vector.load %arg7[%c4, %c0_4] : memref<8x128xf32, #tpu.memory_space<vmem>>, vector<1x128xf32>
    %c0_5 = arith.constant 0 : index
    %c0_6 = arith.constant 0 : index
    %5 = vector.load %arg1[%c0_5, %c0_6] : memref<8x32xbf16, #tpu.memory_space<vmem>>, vector<8x32xbf16>
    %c0_7 = arith.constant 0 : index
    %c0_8 = arith.constant 0 : index
    %6 = vector.load %arg2[%c0_7, %c0_8] : memref<32x128xbf16, #tpu.memory_space<vmem>>, vector<32x128xbf16>
    %cst = arith.constant dense<0.000000e+00> : vector<8x128xf32>
    %7 = tpu.matmul %5, %6, %cst {dimension_numbers = #tpu.dot_dimension_numbers<[1], [0], [0], [1], [0, 0, 1, 1], [], []>} : vector<8x32xbf16>, vector<32x128xbf16>, vector<8x128xf32> -> vector<8x128xf32>
    %8 = vector.broadcast %0 : vector<1x128xf32> to vector<8x128xf32>
    %9 = arith.addf %7, %8 : vector<8x128xf32>
    %cst_9 = arith.constant 0.000000e+00 : f32
    %10 = vector.broadcast %cst_9 : f32 to vector<8x128xf32>
    %11 = arith.maximumf %9, %10 : vector<8x128xf32>
    %12 = arith.truncf %11 : vector<8x128xf32> to vector<8x128xbf16>
    %c0_10 = arith.constant 0 : index
    %c0_11 = arith.constant 0 : index
    %13 = vector.load %arg3[%c0_10, %c0_11] : memref<128x128xbf16, #tpu.memory_space<vmem>>, vector<128x128xbf16>
    %cst_12 = arith.constant dense<0.000000e+00> : vector<8x128xf32>
    %14 = tpu.matmul %12, %13, %cst_12 {dimension_numbers = #tpu.dot_dimension_numbers<[1], [0], [0], [1], [0, 0, 1, 1], [], []>} : vector<8x128xbf16>, vector<128x128xbf16>, vector<8x128xf32> -> vector<8x128xf32>
    %15 = vector.broadcast %1 : vector<1x128xf32> to vector<8x128xf32>
    %16 = arith.addf %14, %15 : vector<8x128xf32>
    %cst_13 = arith.constant 0.000000e+00 : f32
    %17 = vector.broadcast %cst_13 : f32 to vector<8x128xf32>
    %18 = arith.maximumf %16, %17 : vector<8x128xf32>
    %19 = arith.truncf %18 : vector<8x128xf32> to vector<8x128xbf16>
    %c0_14 = arith.constant 0 : index
    %c0_15 = arith.constant 0 : index
    %20 = vector.load %arg4[%c0_14, %c0_15] : memref<128x128xbf16, #tpu.memory_space<vmem>>, vector<128x128xbf16>
    %cst_16 = arith.constant dense<0.000000e+00> : vector<8x128xf32>
    %21 = tpu.matmul %19, %20, %cst_16 {dimension_numbers = #tpu.dot_dimension_numbers<[1], [0], [0], [1], [0, 0, 1, 1], [], []>} : vector<8x128xbf16>, vector<128x128xbf16>, vector<8x128xf32> -> vector<8x128xf32>
    %22 = vector.broadcast %2 : vector<1x128xf32> to vector<8x128xf32>
    %23 = arith.addf %21, %22 : vector<8x128xf32>
    %cst_17 = arith.constant 0.000000e+00 : f32
    %24 = vector.broadcast %cst_17 : f32 to vector<8x128xf32>
    %25 = arith.maximumf %23, %24 : vector<8x128xf32>
    %26 = arith.truncf %25 : vector<8x128xf32> to vector<8x128xbf16>
    %c0_18 = arith.constant 0 : index
    %c0_19 = arith.constant 0 : index
    %27 = vector.load %arg5[%c0_18, %c0_19] : memref<128x128xbf16, #tpu.memory_space<vmem>>, vector<128x128xbf16>
    %cst_20 = arith.constant dense<0.000000e+00> : vector<8x128xf32>
    %28 = tpu.matmul %26, %27, %cst_20 {dimension_numbers = #tpu.dot_dimension_numbers<[1], [0], [0], [1], [0, 0, 1, 1], [], []>} : vector<8x128xbf16>, vector<128x128xbf16>, vector<8x128xf32> -> vector<8x128xf32>
    %29 = vector.broadcast %3 : vector<1x128xf32> to vector<8x128xf32>
    %30 = arith.addf %28, %29 : vector<8x128xf32>
    %31 = tpu.iota {dimensions = array<i32: 1>} : vector<8x128xi32>
    %c3_i32 = arith.constant 3 : i32
    %32 = vector.broadcast %c3_i32 : i32 to vector<8x128xi32>
    %33 = arith.cmpi sge, %31, %32 : vector<8x128xi32>
    %c6_i32 = arith.constant 6 : i32
    %34 = vector.broadcast %c6_i32 : i32 to vector<8x128xi32>
    %35 = arith.cmpi slt, %31, %34 : vector<8x128xi32>
    %36 = arith.andi %33, %35 : vector<8x128xi1>
    %c10_i32 = arith.constant 10 : i32
    %37 = vector.broadcast %c10_i32 : i32 to vector<8x128xi32>
    %38 = arith.cmpi slt, %31, %37 : vector<8x128xi32>
    %cst_21 = arith.constant dense<true> : vector<8x128xi1>
    %39 = arith.xori %36, %cst_21 : vector<8x128xi1>
    %40 = arith.andi %38, %39 : vector<8x128xi1>
    %cst_22 = arith.constant -1.000000e+30 : f32
    %41 = vector.broadcast %cst_22 : f32 to vector<8x128xf32>
    %42 = arith.select %40, %30, %41 : vector<8x128xi1>, vector<8x128xf32>
    %cst_23 = arith.constant dense<0xFF800000> : vector<8xf32>
    %43 = vector.multi_reduction <maximumf>, %42, %cst_23 [1] : vector<8x128xf32> to vector<8xf32>
    %44 = vector.shape_cast %43 : vector<8xf32> to vector<8x1xf32>
    %45 = vector.broadcast %44 : vector<8x1xf32> to vector<8x128xf32>
    %46 = arith.subf %30, %45 : vector<8x128xf32>
    %cst_24 = arith.constant 0.000000e+00 : f32
    %47 = vector.broadcast %cst_24 : f32 to vector<8x128xf32>
    %48 = arith.subf %47, %30 : vector<8x128xf32>
    %cst_25 = arith.constant -1.000000e+30 : f32
    %49 = vector.broadcast %cst_25 : f32 to vector<8x128xf32>
    %50 = arith.select %36, %48, %49 : vector<8x128xi1>, vector<8x128xf32>
    %51 = arith.select %40, %46, %50 : vector<8x128xi1>, vector<8x128xf32>
    %52 = math.exp %51 : vector<8x128xf32>
    %c0_26 = arith.constant 0 : index
    %c0_27 = arith.constant 0 : index
    %53 = vector.load %arg6[%c0_26, %c0_27] : memref<128x128xf32, #tpu.memory_space<vmem>>, vector<128x128xf32>
    %cst_28 = arith.constant dense<0.000000e+00> : vector<8x128xf32>
    %54 = tpu.matmul %52, %53, %cst_28 {dimension_numbers = #tpu.dot_dimension_numbers<[1], [0], [0], [1], [0, 0, 1, 1], [], []>} : vector<8x128xf32>, vector<128x128xf32>, vector<8x128xf32> -> vector<8x128xf32>
    %55 = vector.broadcast %4 : vector<1x128xf32> to vector<8x128xf32>
    %56 = arith.addf %54, %55 : vector<8x128xf32>
    %cst_29 = arith.constant 1.000000e+00 : f32
    %57 = vector.broadcast %cst_29 : f32 to vector<8x128xf32>
    %58 = arith.select %36, %57, %52 : vector<8x128xi1>, vector<8x128xf32>
    %59 = arith.divf %58, %56 : vector<8x128xf32>
    %60 = arith.truncf %59 : vector<8x128xf32> to vector<8x128xbf16>
    %c0_30 = arith.constant 0 : index
    %c0_31 = arith.constant 0 : index
    %61 = vector.load %arg8[%c0_30, %c0_31] : memref<8x128xbf16, #tpu.memory_space<vmem>>, vector<8x128xbf16>
    tpu.vector_store %arg8[%c0_30, %c0_31], %60 {strides = array<i32>} : memref<8x128xbf16, #tpu.memory_space<vmem>>, vector<8x128xbf16>,
    return
  }
  func.func @transform_0(%arg0: i32) -> (i32, i32) {
    %c0_i32 = arith.constant 0 : i32
    %c0_i32_0 = arith.constant 0 : i32
    return %arg0, %c0_i32 : i32, i32
  }
  func.func @transform_1(%arg0: i32) -> (i32, i32) {
    %c0_i32 = arith.constant 0 : i32
    %c0_i32_0 = arith.constant 0 : i32
    %c0_i32_1 = arith.constant 0 : i32
    return %c0_i32, %c0_i32_0 : i32, i32
  }
  func.func @transform_2(%arg0: i32) -> (i32, i32) {
    %c0_i32 = arith.constant 0 : i32
    %c0_i32_0 = arith.constant 0 : i32
    %c0_i32_1 = arith.constant 0 : i32
    return %c0_i32, %c0_i32_0 : i32, i32
  }
  func.func @transform_3(%arg0: i32) -> (i32, i32) {
    %c0_i32 = arith.constant 0 : i32
    %c0_i32_0 = arith.constant 0 : i32
    %c0_i32_1 = arith.constant 0 : i32
    return %c0_i32, %c0_i32_0 : i32, i32
  }
  func.func @transform_4(%arg0: i32) -> (i32, i32) {
    %c0_i32 = arith.constant 0 : i32
    %c0_i32_0 = arith.constant 0 : i32
    %c0_i32_1 = arith.constant 0 : i32
    return %c0_i32, %c0_i32_0 : i32, i32
  }
  func.func @transform_5(%arg0: i32) -> (i32, i32) {
    %c0_i32 = arith.constant 0 : i32
    %c0_i32_0 = arith.constant 0 : i32
    %c0_i32_1 = arith.constant 0 : i32
    return %c0_i32, %c0_i32_0 : i32, i32
  }
  func.func @transform_6(%arg0: i32) -> (i32, i32) {
    %c0_i32 = arith.constant 0 : i32
    %c0_i32_0 = arith.constant 0 : i32
    %c0_i32_1 = arith.constant 0 : i32
    return %c0_i32, %c0_i32_0 : i32, i32
  }
  func.func @transform_7(%arg0: i32) -> (i32, i32) {
    %c0_i32 = arith.constant 0 : i32
    %c0_i32_0 = arith.constant 0 : i32
    return %arg0, %c0_i32 : i32, i32
  }
}

</mosaic_0001>

<bundles_post_ra>
// kernel: _lambda_.1
= control target key start
LH: loop header
LB: loop body
LE: loop exit
PB: predicated region body
PF: predicated region fallthrough
CT: control target
= control target key end

     0   :  { %12 = vsyncpa [#allocation3], 0  ;;  %s844_s0 = inlined_call_operand.vmem [shape: bf16[8,32], index: 0, kind: input, shape index: {}]   ;;  %s845_s1 = inlined_call_operand.hbm [shape: bf16[32,128], index: 1, kind: input, shape index: {}]   ;;  %s846_s2 = inlined_call_operand.hbm [shape: bf16[128,128], index: 2, kind: input, shape index: {}]   ;;  %s847_s3 = inlined_call_operand.hbm [shape: bf16[128,128], index: 3, kind: input, shape index: {}]   ;;  %s848_s4 = inlined_call_operand.hbm [shape: bf16[128,128], index: 4, kind: input, shape index: {}]   ;;  %s849_s5 = inlined_call_operand.hbm [shape: f32[128,128], index: 5, kind: input, shape index: {}]   ;;  %s850_s6 = inlined_call_operand.vmem [shape: f32[8,128], index: 6, kind: input, shape index: {}]   ;;  %s851_s7 = inlined_call_operand.vmem [shape: bf16[8,128], index: 7, kind: output, shape index: {}]  }
   0x1   :  { %13 = vsyncpa [#allocation5], 0 }
   0x2   :  { %14 = vsyncpa [#allocation8], 0  ;;  %s34_s26 = sshll.u32 %s846_s2, 4  ;;  %s740_s27 = smov [#allocation4]   ;;  %s35_s26 = int_to_ptr.hbm [resolvable:$true] %s34_s26 }
   0x3   :  { %s36_s28 = sshll.u32 %s740_s27, 4  ;;  %s60_s8 = sshll.u32 %s848_s4, 4  ;;  %s37_s28 = int_to_ptr.vmem [resolvable:$true] %s36_s28  ;;  %s61_s8 = int_to_ptr.hbm [resolvable:$true] %s60_s8 }
   0x4   :  { %s741_s9 = smov 64   ;;  %s742_s10 = smov 4  }
   0x5   :  { %42 = dma.hbm_to_vmem [thread:$0]  %s35_s26, 1024, %s37_s28, [#allocation5], %s741_s9, %s741_s9, %s742_s10  }
   0x6   :  { %s743_s11 = smov [#allocation7]   ;;  %s21_s15 = sshll.u32 %s845_s1, 4  ;;  %s22_s15 = int_to_ptr.hbm [resolvable:$true] %s21_s15 }
   0x7   :  { %s62_s12 = sshll.u32 %s743_s11, 4  ;;  %s47_s17 = sshll.u32 %s847_s3, 4  ;;  %s63_s12 = int_to_ptr.vmem [resolvable:$true] %s62_s12  ;;  %s48_s17 = int_to_ptr.hbm [resolvable:$true] %s47_s17 }
   0x8   :  { %68 = dma.hbm_to_vmem [thread:$0]  %s61_s8, 1024, %s63_s12, [#allocation8], %s741_s9, %s741_s9, %s742_s10  }
   0x9   :  { %s744_s18 = smov [#allocation2]   ;;  %s745_s4 = smov [#allocation6]  }
   0xa   :  { %s23_s19 = sshll.u32 %s744_s18, 4  ;;  %s49_s20 = sshll.u32 %s745_s4, 4  ;;  %s24_s19 = int_to_ptr.vmem [resolvable:$true] %s23_s19  ;;  %s50_s20 = int_to_ptr.vmem [resolvable:$true] %s49_s20 }
   0xb   :  { %29 = dma.hbm_to_vmem [thread:$0]  %s22_s15, 256, %s24_s19, [#allocation3], %s741_s9, %s741_s9, %s742_s10  }
   0xc   :  { %s73_s23 = sshll.u32 %s849_s5, 4  ;;  %s746_s1 = smov [#allocation9]   ;;  %s74_s23 = int_to_ptr.hbm [resolvable:$true] %s73_s23 }
   0xd   :  { %55 = dma.hbm_to_vmem [thread:$0]  %s48_s17, 1024, %s50_s20, [#allocation5], %s741_s9, %s741_s9, %s742_s10  }
   0xe   :  { %s75_s24 = sshll.u32 %s746_s1, 4  ;;  %s747_s25 = smov 128   ;;  %s76_s24 = int_to_ptr.vmem [resolvable:$true] %s75_s24 }
   0xf   :  { %s748_s26 = smov 8  }
  0x10   :  { %81 = dma.hbm_to_vmem [thread:$0]  %s74_s23, 2048, %s76_s24, [#allocation8], %s747_s25, %s747_s25, %s748_s26  }
  0x11   :  { %734 = dma.done.wait [#allocation3], 256  }
  0x12   :  { %735 = vsyncadd [#allocation3], 4294967040 }
  0x13   :  { %736 = dma.done.wait [#allocation5], 2048  }
  0x14   :  { %737 = vsyncadd [#allocation5], 4294965248 }
  0x15   :  { %738 = dma.done.wait [#allocation8], 3072  }
  0x16   :  { %739 = vsyncadd [#allocation8], 4294964224  ;;  %v570_v0 = vld [vmem:[#allocation2 + $0x8] sm:$0xff]  ;;  %v569_v2 = vld [vmem:[#allocation2] sm:$0xff]  ;;  %vm128_vm0 = vcmask 261120   ;;  %v385_v50 = vlaneseq  ;;  %vm749_vm5 = vmmov 1  }
  0x17   :  { %v578_v1 = vld [vmem:[#allocation4 + $0x38] sm:$0xff]  ;;  %138 = vmatpush.bf16.msra.mxu0 %v570_v0  ;;  %v577_v3 = vld [vmem:[#allocation4 + $0x30] sm:$0xff]  ;;  %v576_v5 = vld [vmem:[#allocation4 + $0x28] sm:$0xff] }
  0x18   :  { %212 = vmatpush.bf16.msra.mxu1 %v578_v1  ;;  %v110_v4 = vld [vmem:[%s844_s0] sm:$0xf]  ;;  %v575_v6 = vld [vmem:[#allocation4 + $0x20] sm:$0xff]  ;;  %v574_v7 = vld [vmem:[#allocation4 + $0x18] sm:$0xff]  ;;  %v386_v53 = vand.u32 127, %v385_v50 }
  0x19   :  { %v573_v8 = vld [vmem:[#allocation4 + $0x10] sm:$0xff]  ;;  %v572_v9 = vld [vmem:[#allocation4 + $0x8] sm:$0xff]  ;;  %v571_v10 = vld [vmem:[#allocation4] sm:$0xff] }
  0x1a   :  { %v586_v11 = vld [vmem:[#allocation6 + $0x38] sm:$0xff]  ;;  %v585_v12 = vld [vmem:[#allocation6 + $0x30] sm:$0xff]  ;;  %v584_v13 = vld [vmem:[#allocation6 + $0x28] sm:$0xff]  ;;  %vm387_vm1 = vcmp.ge.s32.totalorder %v386_v53, 3  ;;  %vm388_vm2 = vcmp.lt.s32.totalorder %v386_v53, 6  ;;  %vm390_vm4 = vcmp.lt.s32.totalorder %v386_v53, 10 }
  0x1b   :  { %139 = vmatpush.bf16.msra.mxu0 %v569_v2  ;;  %292 = vmatpush.bf16.msra.mxu2 %v586_v11  ;;  %v583_v14 = vld [vmem:[#allocation6 + $0x20] sm:$0xff]  ;;  %v582_v15 = vld [vmem:[#allocation6 + $0x18] sm:$0xff]  ;;  %v581_v16 = vld [vmem:[#allocation6 + $0x10] sm:$0xff] }
  0x1c   :  { %213 = vmatpush.bf16.msra.mxu1 %v577_v3  ;;  %v605_v17 = vld [vmem:[%s850_s6] ss:$0 sm:$0xff]  ;;  %v580_v23 = vld [vmem:[#allocation6 + $0x8] sm:$0xff]  ;;  %v579_v24 = vld [vmem:[#allocation6] sm:$0xff] }
  0x1d   :  { %v594_v25 = vld [vmem:[#allocation7 + $0x38] sm:$0xff]  ;;  %v593_v26 = vld [vmem:[#allocation7 + $0x30] sm:$0xff]  ;;  %v592_v27 = vld [vmem:[#allocation7 + $0x28] sm:$0xff] }
  0x1e   :  { %472 = vmatmul.msk.bf16.vlgmr.msra.gmra.mxu0 %vm128_vm0, %v110_v4  ;;  %372 = vmatpush.bf16.msra.mxu3 %v594_v25  ;;  %v591_v28 = vld [vmem:[#allocation7 + $0x20] sm:$0xff]  ;;  %v590_v29 = vld [vmem:[#allocation7 + $0x18] sm:$0xff]  ;;  %v589_v30 = vld [vmem:[#allocation7 + $0x10] sm:$0xff] }
  0x1f   :  { %293 = vmatpush.bf16.msra.mxu2 %v585_v12  ;;  %v606_v31 = vld [vmem:[%s850_s6 + $0x1] ss:$0 sm:$0xff]  ;;  %v588_v37 = vld [vmem:[#allocation7 + $0x8] sm:$0xff]  ;;  %v587_v38 = vld [vmem:[#allocation7] sm:$0xff] }
  0x20   :  { %214 = vmatpush.bf16.msra.mxu1 %v576_v5  ;;  %v607_v39 = vld [vmem:[%s850_s6 + $0x2] ss:$0 sm:$0xff]  ;;  %v417_v45 = vld [vmem:[#allocation9 + $0x78] sm:$0xff]  ;;  %v415_v47 = vld [vmem:[#allocation9 + $0x68] sm:$0xff] }
  0x21   :  { %v416_v46 = vld [vmem:[#allocation9 + $0x70] sm:$0xff]  ;;  %419 = vmatpush.msrb.mxu0 %v417_v45  ;;  %v414_v48 = vld [vmem:[#allocation9 + $0x60] sm:$0xff]  ;;  %v413_v49 = vld [vmem:[#allocation9 + $0x58] sm:$0xff] }
  0x22   :  { %373 = vmatpush.bf16.msra.mxu3 %v593_v26  ;;  %v412_v51 = vld [vmem:[#allocation9 + $0x50] sm:$0xff]  ;;  %v411_v52 = vld [vmem:[#allocation9 + $0x48] sm:$0xff]  ;;  %v410_v54 = vld [vmem:[#allocation9 + $0x40] sm:$0xff] }
  0x23   :  { %294 = vmatpush.bf16.msra.mxu2 %v584_v13  ;;  %420 = vmatpush.msrb.mxu0 %v416_v46  ;;  %v409_v55 = vld [vmem:[#allocation9 + $0x38] sm:$0xff]  ;;  %vm817_vm3 = vmand %vm387_vm1, %vm388_vm2  ;;  %v608_v57 = vld [vmem:[%s850_s6 + $0x3] ss:$0 sm:$0xff] }
  0x24   :  { %215 = vmatpush.bf16.msra.mxu1 %v575_v6  ;;  %vm391_vm6 = vmxor %vm817_vm3, %vm749_vm5  ;;  %v408_v63 = vld [vmem:[#allocation9 + $0x30] sm:$0xff]  ;;  %v407_v0 = vld [vmem:[#allocation9 + $0x28] sm:$0xff] }
  0x25   :  { %421 = vmatpush.msrb.mxu0 %v415_v47  ;;  %vm826_vm7 = vmand %vm390_vm4, %vm391_vm6  ;;  %v406_v1 = vld [vmem:[#allocation9 + $0x20] sm:$0xff]  ;;  %v405_v2 = vld [vmem:[#allocation9 + $0x18] sm:$0xff] }
  0x26   :  { %374 = vmatpush.bf16.msra.mxu3 %v592_v27  ;;  %v404_v3 = vld [vmem:[#allocation9 + $0x10] sm:$0xff]  ;;  %v403_v4 = vld [vmem:[#allocation9 + $0x8] sm:$0xff]  ;;  %v402_v5 = vld [vmem:[#allocation9] sm:$0xff] }
  0x27   :  { %295 = vmatpush.bf16.msra.mxu2 %v583_v14  ;;  %422 = vmatpush.msrb.mxu0 %v414_v48  ;;  %v609_v13 = vld [vmem:[%s850_s6 + $0x4] ss:$0 sm:$0xff] }
  0x28   :  { %216 = vmatpush.bf16.msra.mxu1 %v574_v7 }
  0x29   :  { %423 = vmatpush.msrb.mxu0 %v413_v49 }
  0x2a   :  { %375 = vmatpush.bf16.msra.mxu3 %v591_v28 }
  0x2b   :  { %296 = vmatpush.bf16.msra.mxu2 %v582_v15  ;;  %424 = vmatpush.msrb.mxu0 %v412_v51 }
  0x2c   :  { %217 = vmatpush.bf16.msra.mxu1 %v573_v8 }
  0x2d   :  { %425 = vmatpush.msrb.mxu0 %v411_v52 }
  0x2e   :  { %376 = vmatpush.bf16.msra.mxu3 %v590_v29 }
  0x2f   :  { %297 = vmatpush.bf16.msra.mxu2 %v581_v16  ;;  %426 = vmatpush.msrb.mxu0 %v410_v54 }
  0x30   :  { %218 = vmatpush.bf16.msra.mxu1 %v572_v9 }
  0x31   :  { %427 = vmatpush.msrb.mxu0 %v409_v55 }
  0x32   :  { %377 = vmatpush.bf16.msra.mxu3 %v589_v30 }
  0x33   :  { %298 = vmatpush.bf16.msra.mxu2 %v580_v23  ;;  %428 = vmatpush.msrb.mxu0 %v408_v63 }
  0x34   :  { %219 = vmatpush.bf16.msra.mxu1 %v571_v10 }
  0x35   :  { %429 = vmatpush.msrb.mxu0 %v407_v0 }
  0x36   :  { %378 = vmatpush.bf16.msra.mxu3 %v588_v37 }
  0x37   :  { %299 = vmatpush.bf16.msra.mxu2 %v579_v24  ;;  %430 = vmatpush.msrb.mxu0 %v406_v1 }
  0x39   :  { %431 = vmatpush.msrb.mxu0 %v405_v2 }
  0x3a   :  { %379 = vmatpush.bf16.msra.mxu3 %v587_v38 }
  0x3b   :  { %432 = vmatpush.msrb.mxu0 %v404_v3 }
  0x3d   :  { %433 = vmatpush.msrb.mxu0 %v403_v4 }
  0x3f   :  { %434 = vmatpush.msrb.mxu0 %v402_v5 }
  0x9b   :  { %v141_v18 = vpop.f32.mrf.mxu0 }
  0x9c   :  { %v142_v19 = vadd.f32 %v605_v17, %v141_v18 }
  0x9e   :  { %v145_v20 = vmax.f32 %v142_v19, 0.0 }
  0xa0   :  { %v146_v21 = vpack.c.bf16 %v145_v20, %v145_v20 }
  0xa2   :  { %220 = vmatmul.bf16.vlgmr.msra.gmra.mxu1 %v146_v21 }
  0xa3   :  { %v143_v22 = vpop.f32.mrf.mxu0 }
 0x11f   :  { %v221_v32 = vpop.f32.mrf.mxu1 }
 0x120   :  { %v222_v33 = vadd.f32 %v606_v31, %v221_v32 }
 0x122   :  { %v225_v34 = vmax.f32 %v222_v33, 0.0 }
 0x124   :  { %v226_v35 = vpack.c.bf16 %v225_v34, %v225_v34 }
 0x126   :  { %300 = vmatmul.bf16.vlgmr.msra.gmra.mxu2 %v226_v35 }
 0x127   :  { %v223_v36 = vpop.f32.mrf.mxu1 }
 0x1a9   :  { %v301_v40 = vpop.f32.mrf.mxu2 }
 0x1aa   :  { %v302_v41 = vadd.f32 %v607_v39, %v301_v40 }
 0x1ac   :  { %v305_v42 = vmax.f32 %v302_v41, 0.0 }
 0x1ae   :  { %v306_v43 = vpack.c.bf16 %v305_v42, %v305_v42 }
 0x1b0   :  { %380 = vmatmul.bf16.vlgmr.msra.gmra.mxu3 %v306_v43 }
 0x1b1   :  { %v303_v44 = vpop.f32.mrf.mxu2 }
 0x233   :  { %v381_v58 = vpop.f32.mrf.mxu3 }
 0x234   :  { %v382_v60 = vadd.f32 %v608_v57, %v381_v58 }
 0x236   :  { %v393_v61 = vsel %vm826_vm7, %v382_v60, -1e+30  ;;  %v397_v6 = vsub.f32 0.0, %v382_v60 }
 0x237   :  { %394 = vmax.xlane.f32.xlu0 %v393_v61 }
 0x238   :  { %v398_v9 = vsel %vm817_vm3, %v397_v6, -1e+30 }
 0x23b   :  { %v383_v62 = vpop.f32.mrf.mxu3 }
 0x2aa   :  { %v395_v7 = vpop.xlane.xlu0 %394 }
 0x2ab   :  { %v396_v8 = vsub.f32 %v382_v60, %v395_v7 }
 0x2ad   :  { %v399_v10 = vsel %vm826_vm7, %v396_v8, %v398_v9 }
 0x2ae   :  { %v400_v11 = vmul.f32 1.442695, %v399_v10 }
 0x2b0   :  { %610 = vpow2.f32 %v400_v11 }
 0x2b6   :  { %v611_v12 = vpop.eup %610 }
 0x2b7   :  { %435 = vmatmul.f32.vlgmr.msrb.gmra.mxu0 %v611_v12  ;;  %v439_v25 = vsel %vm817_vm3, 1.0, %v611_v12 }
 0x334   :  { %v436_v14 = vpop.f32.mrf.mxu0 }
 0x335   :  { %v437_v15 = vadd.f32 %v609_v13, %v436_v14 }
 0x337   :  { %612 = vrcp.f32 %v437_v15  ;;  %v451_v19 = vand.u32 2147483648, %v437_v15  ;;  %v449_v21 = vand.u32 2147483647, %v437_v15  ;;  %vm445_vm9 = vweird.f32 %v437_v15 }
 0x339   :  { %v452_v23 = vor.u32 1.1754944e-38, %v451_v19  ;;  %vm450_vm11 = vcmp.eq.f32.partialorder %v449_v21, 8.507059e+37 }
 0x33d   :  { %v613_v16 = vpop.eup %612 }
 0x33e   :  { %v441_v17 = vmul.f32 %v613_v16, %v437_v15  ;;  %vm446_vm8 = vweird.f32 %v613_v16 }
 0x33f   :  { %vm447_vm10 = vmor %vm445_vm9, %vm446_vm8 }
 0x340   :  { %v442_v18 = vsub.f32 1.0, %v441_v17 }
 0x342   :  { %v443_v20 = vmul.f32 %v613_v16, %v442_v18 }
 0x344   :  { %v444_v22 = vadd.f32 %v613_v16, %v443_v20 }
 0x346   :  { %v448_v24 = vsel %vm447_vm10, %v613_v16, %v444_v22 }
 0x347   :  { %v453_v26 = vsel %vm450_vm11, %v452_v23, %v448_v24 }
 0x348   :  { %v454_v27 = vmul.f32 %v453_v26, %v439_v25 }
 0x34a   :  { %v455_v28 = vpack.c.bf16 %v454_v27, %v454_v27 }
 0x34c   :  { %456 = vst [vmem:[%s851_s7] sm:$0xf] %v455_v28 }
 0x34d   :  { %461 = vsyncpa [#allocation3], 1 }
 0x34e   :  { %462 = vsyncpa [#allocation5], 1 }
 0x34f   :  { %463 = vsyncpa [#allocation8], 1 }

</bundles_post_ra>
